<compile_context>
chip_gen: v5e
topology: v5e:2x2
jax: 0.10.0
libtpu: 0.0.40
codegen_flags: <defaults>
</compile_context>

<pallas_src>
import functools

import jax
import jax.numpy as jnp
from jax import lax
from jax.experimental import pallas as pl
from jax.experimental.pallas import tpu as pltpu


def _round_up(x: int, m: int) -> int:
    return ((x + m - 1) // m) * m


def _ls_ce_kernel(cls_ref, pred_ref, tgt_ref, out_ref, *,
                  smoothing: float, n_total: int, tile_n: int, need_mask: bool):
    """One batch tile.

    cls_ref:  (1, C) int32 VMEM      -- hoisted class ids, resident across grid steps
    pred_ref: (TILE_N, C) VMEM       -- logits in their native dtype (f32 or bf16)
    tgt_ref:  (TILE_N, 1) int32 VMEM -- targets
    out_ref:  (1, 8, 128) f32 VMEM   -- per-tile partial loss sum, broadcast over block
    """
    pred = pred_ref[...]                                   # (T, C), native dtype
    c = pred.shape[1]

    # Numerically stable LSE. Elementwise chain stays in the input dtype
    # (bf16-native VPU/EUP on v6e/v7x); the reduction accumulates in f32.
    row_max = jnp.max(pred, axis=1, keepdims=True)                        # (T, 1)
    sum_exp = jnp.sum(jnp.exp(pred - row_max), axis=1, keepdims=True,
                      dtype=jnp.float32)                                  # (T, 1) f32
    lse = jnp.log(sum_exp)                                                # (T, 1) f32

    on = jnp.float32(1.0 - smoothing)
    off = jnp.float32(smoothing / (c - 1))

    # Fused weighted reduction: off*sum_pred + (on-off)*pred[target] in one pass.
    is_tgt = cls_ref[...] == tgt_ref[...]                  # (1,C) vs (T,1) -> (T,C)
    wsum = jnp.sum(jnp.where(is_tgt, on, off) * pred.astype(jnp.float32),
                   axis=1, keepdims=True)                                 # (T, 1) f32

    loss = row_max.astype(jnp.float32) + lse - wsum                       # (T, 1) f32

    if need_mask:
        row_ids = (pl.program_id(0) * tile_n
                   + lax.broadcasted_iota(jnp.int32, loss.shape, 0))
        loss = jnp.where(row_ids < n_total, loss, 0.0)

    partial = jnp.sum(loss, axis=0, keepdims=True)                        # (1, 1)
    out_ref[0] = jnp.broadcast_to(partial, (8, 128))


def label_smoothing_cross_entropy(pred: jax.Array, target: jax.Array,
                                  smoothing: float = 0.1,
                                  tile_n: int | None = None) -> jax.Array:
    """pred: (N, C) float (f32 or bf16), target: (N,) int -> scalar f32 mean loss."""
    n, c = pred.shape
    if c < 2:
        raise ValueError("num_classes must be >= 2 for label smoothing (C-1 divide).")

    itemsize = jnp.dtype(pred.dtype).itemsize
    sublane = 8 if itemsize >= 4 else (16 if itemsize == 2 else 32)

    # Generation-aware VMEM budget (v5e/v6e: 128 MiB -> target 96 MiB; v7x: 64 -> 48).
    try:
        vmem_cap = int(pltpu.get_tpu_info().vmem_capacity_bytes)
    except Exception:
        vmem_cap = 64 * 1024 * 1024          # conservative fallback (fits every gen)
    vmem_target = (vmem_cap * 3) // 4

    # Per batch-row VMEM accounting:
    #   2 * C * itemsize   double-buffered streamed pred tile
    #   4 * C * 4          in-kernel f32-sized temporaries (exp chain, weights, cast)
    per_row_bytes = c * (2 * itemsize + 4 * 4)
    slack = 2 * 1024 * 1024
    if tile_n is None:
        tile_n = max(sublane, (vmem_target - slack) // per_row_bytes)
    tile_n = max(sublane, (int(tile_n) // sublane) * sublane)
    tile_n = min(tile_n, _round_up(n, sublane))

    n_pad = _round_up(n, tile_n)
    num_tiles = n_pad // tile_n
    need_mask = n_pad != n

    target2d = target.astype(jnp.int32).reshape(n, 1)
    if need_mask:  # padded rows are masked to zero loss inside the kernel
        pred = jnp.pad(pred, ((0, n_pad - n), (0, 0)))
        target2d = jnp.pad(target2d, ((0, n_pad - n), (0, 0)))

    class_ids = jnp.arange(c, dtype=jnp.int32).reshape(1, c)   # hoisted iota

    kernel = functools.partial(_ls_ce_kernel, smoothing=float(smoothing),
                               n_total=n, tile_n=tile_n, need_mask=need_mask)

    cost = pl.CostEstimate(
        flops=int(6 * n_pad * c),
        transcendentals=int(n_pad * c),
        bytes_accessed=int(n_pad * c * itemsize + n_pad * 4
                           + num_tiles * 8 * 128 * 4 + c * 4),
    )

    out = pl.pallas_call(
        kernel,
        out_shape=jax.ShapeDtypeStruct((num_tiles, 8, 128), jnp.float32),
        grid=(num_tiles,),
        in_specs=[
            pl.BlockSpec((1, c), lambda i: (0, 0)),          # class ids (resident)
            pl.BlockSpec((tile_n, c), lambda i: (i, 0)),     # pred tile
            pl.BlockSpec((tile_n, 1), lambda i: (i, 0)),     # target tile
        ],
        out_specs=pl.BlockSpec((1, 8, 128), lambda i: (i, 0, 0)),
        compiler_params=pltpu.CompilerParams(
            dimension_semantics=("parallel",),
            vmem_limit_bytes=int(vmem_target)),
        cost_estimate=cost,
    )(class_ids, pred, target2d)

    # Mean over the TRUE batch, done once outside the kernel.
    return jnp.sum(out[:, 0, 0]) / jnp.float32(n)


def _reference(pred, target, smoothing=0.1):
    n, c = pred.shape
    log_probs = jax.nn.log_softmax(pred.astype(jnp.float32), axis=1)
    true_dist = jnp.full((n, c), smoothing / (c - 1), jnp.float32)
    true_dist = true_dist.at[jnp.arange(n), target].set(1.0 - smoothing)
    return jnp.mean(jnp.sum(-true_dist * log_probs, axis=1))


if __name__ == "__main__":
    key = jax.random.PRNGKey(0)
    k1, k2, k3, k4, k5, k6 = jax.random.split(key, 6)

    # 1) Small f32 case matching the module's (batch, num_classes) layout.
    N, C = 8, 16
    pred = jax.random.normal(k1, (N, C), dtype=jnp.float32)
    target = jax.random.randint(k2, (N,), 0, C, dtype=jnp.int32)
    loss = jax.block_until_ready(
        label_smoothing_cross_entropy(pred, target, smoothing=0.1))
    ref = _reference(pred, target, smoothing=0.1)
    assert jnp.allclose(loss, ref, atol=1e-5, rtol=1e-5), (loss, ref)

    # 2) Multi-tile + ragged batch (4 tiles, 14 padded rows masked in-kernel).
    N2, C2 = 50, 16
    pred2 = jax.random.normal(k3, (N2, C2), dtype=jnp.float32)
    target2 = jax.random.randint(k4, (N2,), 0, C2, dtype=jnp.int32)
    loss2 = jax.block_until_ready(
        label_smoothing_cross_entropy(pred2, target2, smoothing=0.1, tile_n=16))
    ref2 = _reference(pred2, target2, smoothing=0.1)
    assert jnp.allclose(loss2, ref2, atol=1e-5, rtol=1e-5), (loss2, ref2)

    # 3) bf16-native path (elementwise in bf16, f32 accumulation) with padding.
    N3, C3 = 24, 16
    pred3 = jax.random.normal(k5, (N3, C3), dtype=jnp.float32).astype(jnp.bfloat16)
    target3 = jax.random.randint(k6, (N3,), 0, C3, dtype=jnp.int32)
    loss3 = jax.block_until_ready(
        label_smoothing_cross_entropy(pred3, target3, smoothing=0.1))
    ref3 = _reference(pred3.astype(jnp.float32), target3, smoothing=0.1)
    assert jnp.allclose(loss3, ref3, atol=2e-2, rtol=2e-2), (loss3, ref3)

    print("KERNEL_OK")
</pallas_src>

<mosaic_0001>
module attributes {stable_mosaic.version = 11 : i64} {
  func.func @_ls_ce_kernel(%arg0: i32, %arg1: memref<1x16xi32, #tpu.memory_space<vmem>>, %arg2: memref<8x16xf32, #tpu.memory_space<vmem>>, %arg3: memref<8x1xi32, #tpu.memory_space<vmem>>, %arg4: memref<1x8x128xf32, #tpu.memory_space<vmem>>) attributes {dimension_semantics = [#tpu.dimension_semantics<parallel>], iteration_bounds = array<i64: 1>, scalar_prefetch = 0 : i64, scratch_operands = 0 : i64, tpu.core_type = #tpu.core_type<tc>, window_params = [{pipeline_mode = #tpu.pipeline_mode<synchronous>, transform_indices = @transform_0, window_bounds = array<i64: 1, 16>}, {transform_indices = @transform_1, window_bounds = array<i64: 8, 16>}, {transform_indices = @transform_2, window_bounds = array<i64: 8, 1>}, {transform_indices = @transform_3, window_bounds = array<i64: 1, 8, 128>}]} {
    %c0 = arith.constant 0 : index
    %c0_0 = arith.constant 0 : index
    %0 = vector.load %arg2[%c0, %c0_0] : memref<8x16xf32, #tpu.memory_space<vmem>>, vector<8x16xf32>
    %cst = arith.constant dense<0xFF800000> : vector<8xf32>
    %1 = vector.multi_reduction <maximumf>, %0, %cst [1] : vector<8x16xf32> to vector<8xf32>
    %2 = vector.shape_cast %1 : vector<8xf32> to vector<8x1xf32>
    %3 = vector.broadcast %2 : vector<8x1xf32> to vector<8x16xf32>
    %4 = arith.subf %0, %3 : vector<8x16xf32>
    %5 = math.exp %4 : vector<8x16xf32>
    %cst_1 = arith.constant dense<0.000000e+00> : vector<8xf32>
    %6 = vector.multi_reduction <add>, %5, %cst_1 [1] : vector<8x16xf32> to vector<8xf32>
    %7 = vector.shape_cast %6 : vector<8xf32> to vector<8x1xf32>
    %8 = math.log %7 : vector<8x1xf32>
    %c0_2 = arith.constant 0 : index
    %c0_3 = arith.constant 0 : index
    %9 = vector.load %arg1[%c0_2, %c0_3] : memref<1x16xi32, #tpu.memory_space<vmem>>, vector<1x16xi32>
    %c0_4 = arith.constant 0 : index
    %c0_5 = arith.constant 0 : index
    %10 = vector.load %arg3[%c0_4, %c0_5] : memref<8x1xi32, #tpu.memory_space<vmem>>, vector<8x1xi32>
    %11 = vector.broadcast %9 : vector<1x16xi32> to vector<8x16xi32>
    %12 = vector.broadcast %10 : vector<8x1xi32> to vector<8x16xi32>
    %13 = arith.cmpi eq, %11, %12 : vector<8x16xi32>
    %cst_6 = arith.constant 0.899999976 : f32
    %cst_7 = arith.constant 0.00666666683 : f32
    %14 = vector.broadcast %cst_6 : f32 to vector<8x16xf32>
    %15 = vector.broadcast %cst_7 : f32 to vector<8x16xf32>
    %16 = arith.select %13, %14, %15 : vector<8x16xi1>, vector<8x16xf32>
    %17 = arith.mulf %16, %0 : vector<8x16xf32>
    %cst_8 = arith.constant dense<0.000000e+00> : vector<8xf32>
    %18 = vector.multi_reduction <add>, %17, %cst_8 [1] : vector<8x16xf32> to vector<8xf32>
    %19 = vector.shape_cast %18 : vector<8xf32> to vector<8x1xf32>
    %20 = arith.addf %2, %8 : vector<8x1xf32>
    %21 = arith.subf %20, %19 : vector<8x1xf32>
    %cst_9 = arith.constant dense<0.000000e+00> : vector<1xf32>
    %22 = vector.multi_reduction <add>, %21, %cst_9 [0] : vector<8x1xf32> to vector<1xf32>
    %23 = vector.shape_cast %22 : vector<1xf32> to vector<1x1xf32>
    %24 = vector.shape_cast %23 : vector<1x1xf32> to vector<1x1xf32>
    %25 = vector.broadcast %24 : vector<1x1xf32> to vector<8x128xf32>
    %c0_10 = arith.constant 0 : index
    %c0_11 = arith.constant 0 : index
    %c0_12 = arith.constant 0 : index
    %26 = vector.load %arg4[%c0_10, %c0_11, %c0_12] : memref<1x8x128xf32, #tpu.memory_space<vmem>>, vector<1x8x128xf32>
    %27 = vector.shape_cast %26 : vector<1x8x128xf32> to vector<8x128xf32>
    %28 = vector.shape_cast %25 : vector<8x128xf32> to vector<1x8x128xf32>
    tpu.vector_store %arg4[%c0_10, %c0_11, %c0_12], %28 {strides = array<i32>} : memref<1x8x128xf32, #tpu.memory_space<vmem>>, vector<1x8x128xf32>,
    return
  }
  func.func @transform_0(%arg0: i32) -> (i32, i32) {
    %c0_i32 = arith.constant 0 : i32
    %c0_i32_0 = arith.constant 0 : i32
    %c0_i32_1 = arith.constant 0 : i32
    return %c0_i32, %c0_i32_0 : i32, i32
  }
  func.func @transform_1(%arg0: i32) -> (i32, i32) {
    %c0_i32 = arith.constant 0 : i32
    %c0_i32_0 = arith.constant 0 : i32
    return %arg0, %c0_i32 : i32, i32
  }
  func.func @transform_2(%arg0: i32) -> (i32, i32) {
    %c0_i32 = arith.constant 0 : i32
    %c0_i32_0 = arith.constant 0 : i32
    return %arg0, %c0_i32 : i32, i32
  }
  func.func @transform_3(%arg0: i32) -> (i32, i32, i32) {
    %c0_i32 = arith.constant 0 : i32
    %c0_i32_0 = arith.constant 0 : i32
    %c0_i32_1 = arith.constant 0 : i32
    return %arg0, %c0_i32, %c0_i32_0 : i32, i32, i32
  }
}

</mosaic_0001>

<bundles_post_ra>
// kernel: tpu_custom_call.1
= control target key start
LH: loop header
LB: loop body
LE: loop exit
PB: predicated region body
PF: predicated region fallthrough
CT: control target
= control target key end

     0   :  { %vm16_vm0 = vcmask 130048   ;;  %v100_v2 = vmov 0   ;;  %s138_s0 = inlined_call_operand.vmem [shape: s32[1,16], index: 0, kind: input, shape index: {}]   ;;  %s139_s1 = inlined_call_operand.vmem [shape: f32[8,16], index: 1, kind: input, shape index: {}]   ;;  %s140_s2 = inlined_call_operand.vmem [shape: s32[8,1], index: 2, kind: input, shape index: {}]   ;;  %s141_s3 = inlined_call_operand.hbm [shape: f32[1,8,128], index: 3, kind: output, shape index: {}]  }
   0x1   :  { %v15_v0 = vld [vmem:[%s139_s1] sm:$0xff]  ;;  %68 = vset.pattern.permute.xlu0 %v100_v2 }
   0x2   :  { %v17_v1 = vsel %vm16_vm0, %v15_v0, -inf }
   0x3   :  { %8 = vsyncpa [#allocation3], 0  ;;  %18 = vmax.xlane.f32.xlu0 %v17_v1  ;;  %v29_v3 = vld [vmem:[%s140_s2] sm:$0xff]  ;;  %v101_v11 = vmov 0.006666667   ;;  %s56_s19 = sshll.u32 %s141_s3, 4  ;;  %s57_s19 = int_to_ptr.hbm [resolvable:$true] %s56_s19 }
   0x4   :  { %v69_v9 = vld [vmem:[%s138_s0] ss:$0 sm:$0xff]  ;;  %s102_s0 = smov [#allocation2]  }
   0x5   :  { %s54_s2 = sshll.u32 %s102_s0, 4  ;;  %s55_s2 = int_to_ptr.vmem [resolvable:$true] %s54_s2 }
  0x17   :  { %32 = vperm.xlu0 %68, %v29_v3  }
  0x76   :  { %v19_v4 = vpop.xlane.xlu0 %18 }
  0x77   :  { %v20_v5 = vsub.f32 %v15_v0, %v19_v4 }
  0x79   :  { %v21_v6 = vmul.f32 1.442695, %v20_v5 }
  0x7b   :  { %70 = vpow2.f32 %v21_v6 }
  0x81   :  { %v71_v7 = vpop.eup %70 }
  0x82   :  { %v23_v8 = vsel %vm16_vm0, %v71_v7, 0.0 }
  0x83   :  { %24 = vadd.xlane.f32.xlu1 %v23_v8 }
  0x89   :  { %v33_v10 = vpop.permute.xlu0 %32 }
  0x8a   :  { %vm34_vm1 = vcmp.eq.s32.totalorder %v69_v9, %v33_v10 }
  0x8b   :  { %v35_v12 = vsel %vm34_vm1, 0.9, %v101_v11 }
  0x8c   :  { %v36_v13 = vmul.f32 %v35_v12, %v15_v0 }
  0x8e   :  { %v37_v14 = vsel %vm16_vm0, %v36_v13, 0.0 }
  0x8f   :  { %38 = vadd.xlane.f32.xlu1 %v37_v14 }
  0xf6   :  { %v25_v15 = vpop.xlane.xlu1 %24 }
  0xf7   :  { %72 = vlog2.f32 %v25_v15 }
  0xfd   :  { %v73_v16 = vpop.eup %72 }
  0xfe   :  { %v27_v17 = vmul.f32 0.6931472, %v73_v16 }
 0x100   :  { %v40_v18 = vadd.f32 %v27_v17, %v19_v4 }
 0x102   :  { %v39_v19 = vpop.xlane.xlu1 %38 }
 0x103   :  { %v41_v20 = vsub.f32 %v40_v18, %v39_v19 }
 0x105   :  { %v42_v21 = vrot.slane %v41_v20, 4 }
 0x107   :  { %v43_v22 = vadd.f32 %v42_v21, %v41_v20 }
 0x109   :  { %v44_v23 = vrot.slane %v43_v22, 2 }
 0x10b   :  { %v45_v24 = vadd.f32 %v44_v23, %v43_v22 }
 0x10d   :  { %v46_v25 = vrot.slane %v45_v24, 1 }
 0x10f   :  { %v47_v26 = vadd.f32 %v46_v25, %v45_v24 }
 0x111   :  { %48 = vst [vmem:[#allocation2] sm:$0xff] %v47_v26 }
 0x112   :  { %59 = dma.vmem_to_hbm [thread:$0]  %s55_s2, 128, %s57_s19, [#allocation3]  }
 0x113   :  { %98 = dma.done.wait [#allocation3], 128  }
 0x114   :  { %99 = vsyncadd [#allocation3], 4294967168 }
 0x115   :  { %64 = vsyncpa [#allocation3], 1 }

</bundles_post_ra>
